<compile_context>
chip_gen: v6e
topology: v6e:2x2x1
jax: 0.10.0
libtpu: 0.0.40
codegen_flags: <defaults>
</compile_context>

<pallas_src>
import math
from functools import partial

import jax
import jax.numpy as jnp
from jax.experimental import pallas as pl
from jax.experimental.pallas import tpu as pltpu


def transformer_block_kernel(x_ref,
                             wq_ref, wk_ref, wv_ref,
                             bq_ref, bk_ref, bv_ref,
                             wo_ref, bo_ref,
                             w1_ref, b1_ref,
                             w2_ref, b2_ref,
                             out_ref,
                             attn_ref,
                             *, n_heads: int, bt: int, seq: int):
    Bt, S = bt, seq
    E = x_ref.shape[-1]
    hd = E // n_heads
    scale = 1.0 / math.sqrt(hd)

    # Lane-dense (Bt*S, E) activation slab.
    x = x_ref[...].astype(jnp.float32)
    x_bf = x.astype(jnp.bfloat16)

    # ---- QKV projections: bf16 operands on the MXU, f32 accumulation. ----
    q = jnp.dot(x_bf, wq_ref[...], preferred_element_type=jnp.float32) + bq_ref[...]
    k = jnp.dot(x_bf, wk_ref[...], preferred_element_type=jnp.float32) + bk_ref[...]
    v = jnp.dot(x_bf, wv_ref[...], preferred_element_type=jnp.float32) + bv_ref[...]

    # Fold 1/sqrt(hd) into q once (cheaper than scaling the (S,S) scores).
    # Reshape in f32 (8-sublane aligned), then cast to bf16 for the MXU.
    q3 = (q * scale).reshape(Bt, S, E).astype(jnp.bfloat16)
    k3 = k.reshape(Bt, S, E).astype(jnp.bfloat16)
    v3 = v.reshape(Bt, S, E).astype(jnp.bfloat16)

    # ---- Multi-head self-attention ----
    # Batched (over Bt) contraction per head; no explicit K transpose, no
    # lane-axis concatenate (heads land in the attn_ref VMEM scratch slab).
    for h in range(n_heads):
        lo = h * hd
        qh = q3[:, :, lo:lo + hd]                         # (Bt, S, hd)
        kh = k3[:, :, lo:lo + hd]
        vh = v3[:, :, lo:lo + hd]
        s = jnp.einsum('bqd,bkd->bqk', qh, kh,
                       preferred_element_type=jnp.float32)  # (Bt, S, S)
        s = s - jnp.max(s, axis=-1, keepdims=True)
        p = jnp.exp(s)
        denom = jnp.sum(p, axis=-1, keepdims=True)
        p = p * pl.reciprocal(denom, approx=True)            # EUP, not VALU
        oh = jnp.einsum('bqk,bkd->bqd', p.astype(jnp.bfloat16), vh,
                        preferred_element_type=jnp.float32)   # (Bt, S, hd)
        attn_ref[:, :, lo:lo + hd] = oh

    attn = jnp.dot(attn_ref[...].reshape(Bt * S, E).astype(jnp.bfloat16),
                   wo_ref[...], preferred_element_type=jnp.float32) + bo_ref[...]

    # residual 1 (f32)
    y = x + attn

    # ---- Feed-forward (dropout=0 -> identity; norm2 output is dead in the
    # reference forward, so it is intentionally not computed). ----
    z = jnp.dot(y.astype(jnp.bfloat16), w1_ref[...],
                preferred_element_type=jnp.float32) + b1_ref[...]
    z = jnp.maximum(z, 0.0)                                   # ReLU
    z = jnp.dot(z.astype(jnp.bfloat16), w2_ref[...],
                preferred_element_type=jnp.float32) + b2_ref[...]

    out_ref[...] = (y + z).astype(out_ref.dtype)


def transformer_block(x, params, *, n_heads, batch_tile=None):
    """x: (B, S, E) float32. params: dict of pre-transposed weights."""
    B, S, E = x.shape
    H = params["w1"].shape[1]
    assert E % n_heads == 0, (E, n_heads)
    Bt = B if batch_tile is None else batch_tile
    assert B % Bt == 0, (B, Bt)

    # Lane-dense layout: the kernel works on (Bt*S, E) slabs.
    x2 = x.reshape(B * S, E)

    # bf16 weights: half the DMA bytes / VMEM; biases stay f32.
    wq = params["wq"].astype(jnp.bfloat16)
    wk = params["wk"].astype(jnp.bfloat16)
    wv = params["wv"].astype(jnp.bfloat16)
    wo = params["wo"].astype(jnp.bfloat16)
    w1 = params["w1"].astype(jnp.bfloat16)
    w2 = params["w2"].astype(jnp.bfloat16)

    def full(shape):
        return pl.BlockSpec(shape, lambda b, _s=shape: (0,) * len(_s))

    # Advisory cost estimate so XLA can overlap the custom call.
    flops = int(2 * B * S * E * E * 4        # q,k,v,out projections
                + 4 * B * S * S * E          # q@k^T + p@v (all heads)
                + 4 * B * S * E * H)         # fc1 + fc2
    transcendentals = int(B * n_heads * S * S)          # exp in softmax
    bytes_accessed = int(2 * B * S * E * 4              # x read + out write
                         + (4 * E * E + 2 * E * H) * 2  # bf16 weights
                         + (5 * E + H) * 4)             # f32 biases

    out2 = pl.pallas_call(
        partial(transformer_block_kernel, n_heads=n_heads, bt=Bt, seq=S),
        out_shape=jax.ShapeDtypeStruct((B * S, E), x.dtype),
        grid_spec=pltpu.PrefetchScalarGridSpec(
            num_scalar_prefetch=0,
            grid=(B // Bt,),
            in_specs=[
                pl.BlockSpec((Bt * S, E), lambda b: (b, 0)),     # x slab
                full((E, E)), full((E, E)), full((E, E)),        # Wq, Wk, Wv
                full((1, E)), full((1, E)), full((1, E)),        # bq, bk, bv
                full((E, E)), full((1, E)),                      # Wo, bo
                full((E, H)), full((1, H)),                      # W1, b1
                full((H, E)), full((1, E)),                      # W2, b2
            ],
            out_specs=pl.BlockSpec((Bt * S, E), lambda b: (b, 0)),
            scratch_shapes=[pltpu.VMEM((Bt, S, E), jnp.float32)],  # head outs
        ),
        compiler_params=pltpu.CompilerParams(
            dimension_semantics=("parallel",),
            vmem_limit_bytes=64 * 1024 * 1024),
        cost_estimate=pl.CostEstimate(
            flops=flops, transcendentals=transcendentals,
            bytes_accessed=bytes_accessed),
    )(x2,
      wq, wk, wv,
      params["bq"], params["bk"], params["bv"],
      wo, params["bo"],
      w1, params["b1"],
      w2, params["b2"])

    return out2.reshape(B, S, E)


def init_params(key, embedding_size, n_hidden):
    """Deterministic synthetic parameters (shapes match the PyTorch module).

    Weights are stored pre-transposed so the kernel computes `x @ W + b`,
    equivalent to PyTorch's `x @ W_pt.T + b`.
    """
    E, H = embedding_size, n_hidden
    ks = jax.random.split(key, 9)
    scl = 0.1
    return {
        # nn.MultiheadAttention: in_proj_weight (3E,E) split into q/k/v; out_proj (E,E)
        "wq": scl * jax.random.normal(ks[0], (E, E), jnp.float32),
        "wk": scl * jax.random.normal(ks[1], (E, E), jnp.float32),
        "wv": scl * jax.random.normal(ks[2], (E, E), jnp.float32),
        "bq": scl * jax.random.normal(ks[3], (1, E), jnp.float32),
        "bk": scl * jax.random.normal(ks[4], (1, E), jnp.float32),
        "bv": scl * jax.random.normal(ks[5], (1, E), jnp.float32),
        "wo": scl * jax.random.normal(ks[6], (E, E), jnp.float32),
        "bo": jnp.zeros((1, E), jnp.float32),
        # fc1: Linear(E, H), fc2: Linear(H, E)
        "w1": scl * jax.random.normal(ks[7], (E, H), jnp.float32),
        "b1": jnp.zeros((1, H), jnp.float32),
        "w2": scl * jax.random.normal(ks[8], (H, E), jnp.float32),
        "b2": jnp.zeros((1, E), jnp.float32),
        # NOTE: norm1 / norm2 parameters are omitted — their outputs are dead
        # in the reference forward() and never affect the result.
    }


if __name__ == "__main__":
    B, S, E, H, NH = 2, 8, 32, 64, 4   # batch, seq, embedding, hidden, heads

    key = jax.random.PRNGKey(0)
    k_x, k_p = jax.random.split(key)
    x = jax.random.normal(k_x, (B, S, E), jnp.float32)
    params = init_params(k_p, E, H)

    out = transformer_block(x, params, n_heads=NH)
    jax.block_until_ready(out)
    assert out.shape == (B, S, E), out.shape
    print("KERNEL_OK")
</pallas_src>

<mosaic_0001>
module attributes {stable_mosaic.version = 11 : i64} {
  func.func @transformer_block_kernel(%arg0: i32, %arg1: memref<16x32xf32, #tpu.memory_space<vmem>>, %arg2: memref<32x32xbf16, #tpu.memory_space<vmem>>, %arg3: memref<32x32xbf16, #tpu.memory_space<vmem>>, %arg4: memref<32x32xbf16, #tpu.memory_space<vmem>>, %arg5: memref<1x32xf32, #tpu.memory_space<vmem>>, %arg6: memref<1x32xf32, #tpu.memory_space<vmem>>, %arg7: memref<1x32xf32, #tpu.memory_space<vmem>>, %arg8: memref<32x32xbf16, #tpu.memory_space<vmem>>, %arg9: memref<1x32xf32, #tpu.memory_space<vmem>>, %arg10: memref<32x64xbf16, #tpu.memory_space<vmem>>, %arg11: memref<1x64xf32, #tpu.memory_space<vmem>>, %arg12: memref<64x32xbf16, #tpu.memory_space<vmem>>, %arg13: memref<1x32xf32, #tpu.memory_space<vmem>>, %arg14: memref<16x32xf32, #tpu.memory_space<vmem>>, %arg15: memref<2x8x32xf32, #tpu.memory_space<vmem>>) attributes {dimension_semantics = [#tpu.dimension_semantics<parallel>], iteration_bounds = array<i64: 1>, scalar_prefetch = 0 : i64, scratch_operands = 1 : i64, tpu.core_type = #tpu.core_type<tc>, window_params = [{transform_indices = @transform_0, window_bounds = array<i64: 16, 32>}, {pipeline_mode = #tpu.pipeline_mode<synchronous>, transform_indices = @transform_1, window_bounds = array<i64: 32, 32>}, {pipeline_mode = #tpu.pipeline_mode<synchronous>, transform_indices = @transform_2, window_bounds = array<i64: 32, 32>}, {pipeline_mode = #tpu.pipeline_mode<synchronous>, transform_indices = @transform_3, window_bounds = array<i64: 32, 32>}, {pipeline_mode = #tpu.pipeline_mode<synchronous>, transform_indices = @transform_4, window_bounds = array<i64: 1, 32>}, {pipeline_mode = #tpu.pipeline_mode<synchronous>, transform_indices = @transform_5, window_bounds = array<i64: 1, 32>}, {pipeline_mode = #tpu.pipeline_mode<synchronous>, transform_indices = @transform_6, window_bounds = array<i64: 1, 32>}, {pipeline_mode = #tpu.pipeline_mode<synchronous>, transform_indices = @transform_7, window_bounds = array<i64: 32, 32>}, {pipeline_mode = #tpu.pipeline_mode<synchronous>, transform_indices = @transform_8, window_bounds = array<i64: 1, 32>}, {pipeline_mode = #tpu.pipeline_mode<synchronous>, transform_indices = @transform_9, window_bounds = array<i64: 32, 64>}, {pipeline_mode = #tpu.pipeline_mode<synchronous>, transform_indices = @transform_10, window_bounds = array<i64: 1, 64>}, {pipeline_mode = #tpu.pipeline_mode<synchronous>, transform_indices = @transform_11, window_bounds = array<i64: 64, 32>}, {pipeline_mode = #tpu.pipeline_mode<synchronous>, transform_indices = @transform_12, window_bounds = array<i64: 1, 32>}, {transform_indices = @transform_13, window_bounds = array<i64: 16, 32>}]} {
    %c0 = arith.constant 0 : index
    %c0_0 = arith.constant 0 : index
    %0 = vector.load %arg1[%c0, %c0_0] : memref<16x32xf32, #tpu.memory_space<vmem>>, vector<16x32xf32>
    %1 = arith.truncf %0 : vector<16x32xf32> to vector<16x32xbf16>
    %c0_1 = arith.constant 0 : index
    %c0_2 = arith.constant 0 : index
    %2 = vector.load %arg2[%c0_1, %c0_2] : memref<32x32xbf16, #tpu.memory_space<vmem>>, vector<32x32xbf16>
    %cst = arith.constant dense<0.000000e+00> : vector<16x32xf32>
    %3 = tpu.matmul %1, %2, %cst {dimension_numbers = #tpu.dot_dimension_numbers<[1], [0], [0], [1], [0, 0, 1, 1], [], []>} : vector<16x32xbf16>, vector<32x32xbf16>, vector<16x32xf32> -> vector<16x32xf32>
    %c0_3 = arith.constant 0 : index
    %c0_4 = arith.constant 0 : index
    %4 = vector.load %arg5[%c0_3, %c0_4] : memref<1x32xf32, #tpu.memory_space<vmem>>, vector<1x32xf32>
    %5 = vector.broadcast %4 : vector<1x32xf32> to vector<16x32xf32>
    %6 = arith.addf %3, %5 : vector<16x32xf32>
    %c0_5 = arith.constant 0 : index
    %c0_6 = arith.constant 0 : index
    %7 = vector.load %arg3[%c0_5, %c0_6] : memref<32x32xbf16, #tpu.memory_space<vmem>>, vector<32x32xbf16>
    %cst_7 = arith.constant dense<0.000000e+00> : vector<16x32xf32>
    %8 = tpu.matmul %1, %7, %cst_7 {dimension_numbers = #tpu.dot_dimension_numbers<[1], [0], [0], [1], [0, 0, 1, 1], [], []>} : vector<16x32xbf16>, vector<32x32xbf16>, vector<16x32xf32> -> vector<16x32xf32>
    %c0_8 = arith.constant 0 : index
    %c0_9 = arith.constant 0 : index
    %9 = vector.load %arg6[%c0_8, %c0_9] : memref<1x32xf32, #tpu.memory_space<vmem>>, vector<1x32xf32>
    %10 = vector.broadcast %9 : vector<1x32xf32> to vector<16x32xf32>
    %11 = arith.addf %8, %10 : vector<16x32xf32>
    %c0_10 = arith.constant 0 : index
    %c0_11 = arith.constant 0 : index
    %12 = vector.load %arg4[%c0_10, %c0_11] : memref<32x32xbf16, #tpu.memory_space<vmem>>, vector<32x32xbf16>
    %cst_12 = arith.constant dense<0.000000e+00> : vector<16x32xf32>
    %13 = tpu.matmul %1, %12, %cst_12 {dimension_numbers = #tpu.dot_dimension_numbers<[1], [0], [0], [1], [0, 0, 1, 1], [], []>} : vector<16x32xbf16>, vector<32x32xbf16>, vector<16x32xf32> -> vector<16x32xf32>
    %c0_13 = arith.constant 0 : index
    %c0_14 = arith.constant 0 : index
    %14 = vector.load %arg7[%c0_13, %c0_14] : memref<1x32xf32, #tpu.memory_space<vmem>>, vector<1x32xf32>
    %15 = vector.broadcast %14 : vector<1x32xf32> to vector<16x32xf32>
    %16 = arith.addf %13, %15 : vector<16x32xf32>
    %cst_15 = arith.constant 0.353553385 : f32
    %17 = vector.broadcast %cst_15 : f32 to vector<16x32xf32>
    %18 = arith.mulf %6, %17 : vector<16x32xf32>
    %19 = vector.shape_cast %18 : vector<16x32xf32> to vector<2x8x32xf32>
    %20 = arith.truncf %19 : vector<2x8x32xf32> to vector<2x8x32xbf16>
    %21 = vector.shape_cast %11 : vector<16x32xf32> to vector<2x8x32xf32>
    %22 = arith.truncf %21 : vector<2x8x32xf32> to vector<2x8x32xbf16>
    %23 = vector.shape_cast %16 : vector<16x32xf32> to vector<2x8x32xf32>
    %24 = arith.truncf %23 : vector<2x8x32xf32> to vector<2x8x32xbf16>
    %25 = vector.extract_strided_slice %20 {offsets = [0, 0, 0], sizes = [2, 8, 8], strides = [1, 1, 1]} : vector<2x8x32xbf16> to vector<2x8x8xbf16>
    %26 = vector.extract_strided_slice %22 {offsets = [0, 0, 0], sizes = [2, 8, 8], strides = [1, 1, 1]} : vector<2x8x32xbf16> to vector<2x8x8xbf16>
    %27 = vector.extract_strided_slice %24 {offsets = [0, 0, 0], sizes = [2, 8, 8], strides = [1, 1, 1]} : vector<2x8x32xbf16> to vector<2x8x8xbf16>
    "tpu.trace_start"() <{level = 10 : i32, message = "bqd,bkd->bqk"}> : () -> ()
    %cst_16 = arith.constant dense<0.000000e+00> : vector<2x8x8xf32>
    %28 = tpu.matmul %25, %26, %cst_16 {dimension_numbers = #tpu.dot_dimension_numbers<[2], [2], [1], [1], [0, 0, 0, 1, 1, 1], [0], [0]>} : vector<2x8x8xbf16>, vector<2x8x8xbf16>, vector<2x8x8xf32> -> vector<2x8x8xf32>
    "tpu.trace_stop"() : () -> ()
    %cst_17 = arith.constant dense<0xFF800000> : vector<2x8xf32>
    %29 = vector.multi_reduction <maximumf>, %28, %cst_17 [2] : vector<2x8x8xf32> to vector<2x8xf32>
    %30 = vector.shape_cast %29 : vector<2x8xf32> to vector<2x8x1xf32>
    %31 = vector.broadcast %30 : vector<2x8x1xf32> to vector<2x8x8xf32>
    %32 = arith.subf %28, %31 : vector<2x8x8xf32>
    %33 = math.exp %32 : vector<2x8x8xf32>
    %cst_18 = arith.constant dense<0.000000e+00> : vector<2x8xf32>
    %34 = vector.multi_reduction <add>, %33, %cst_18 [2] : vector<2x8x8xf32> to vector<2x8xf32>
    %35 = vector.shape_cast %34 : vector<2x8xf32> to vector<2x8x1xf32>
    %36 = tpu.reciprocal %35 {approx = true} : vector<2x8x1xf32> -> vector<2x8x1xf32>
    %37 = vector.broadcast %36 : vector<2x8x1xf32> to vector<2x8x8xf32>
    %38 = arith.mulf %33, %37 : vector<2x8x8xf32>
    %39 = arith.truncf %38 : vector<2x8x8xf32> to vector<2x8x8xbf16>
    "tpu.trace_start"() <{level = 10 : i32, message = "bqk,bkd->bqd"}> : () -> ()
    %cst_19 = arith.constant dense<0.000000e+00> : vector<2x8x8xf32>
    %40 = tpu.matmul %39, %27, %cst_19 {dimension_numbers = #tpu.dot_dimension_numbers<[2], [1], [1], [2], [0, 0, 0, 1, 1, 2], [0], [0]>} : vector<2x8x8xbf16>, vector<2x8x8xbf16>, vector<2x8x8xf32> -> vector<2x8x8xf32>
    "tpu.trace_stop"() : () -> ()
    %c0_20 = arith.constant 0 : index
    %c0_21 = arith.constant 0 : index
    %c0_22 = arith.constant 0 : index
    %41 = vector.load %arg15[%c0_20, %c0_21, %c0_22] : memref<2x8x32xf32, #tpu.memory_space<vmem>>, vector<2x8x8xf32>
    tpu.vector_store %arg15[%c0_20, %c0_21, %c0_22], %40 {strides = array<i32>} : memref<2x8x32xf32, #tpu.memory_space<vmem>>, vector<2x8x8xf32>,
    %42 = vector.extract_strided_slice %20 {offsets = [0, 0, 8], sizes = [2, 8, 8], strides = [1, 1, 1]} : vector<2x8x32xbf16> to vector<2x8x8xbf16>
    %43 = vector.extract_strided_slice %22 {offsets = [0, 0, 8], sizes = [2, 8, 8], strides = [1, 1, 1]} : vector<2x8x32xbf16> to vector<2x8x8xbf16>
    %44 = vector.extract_strided_slice %24 {offsets = [0, 0, 8], sizes = [2, 8, 8], strides = [1, 1, 1]} : vector<2x8x32xbf16> to vector<2x8x8xbf16>
    "tpu.trace_start"() <{level = 10 : i32, message = "bqd,bkd->bqk"}> : () -> ()
    %cst_23 = arith.constant dense<0.000000e+00> : vector<2x8x8xf32>
    %45 = tpu.matmul %42, %43, %cst_23 {dimension_numbers = #tpu.dot_dimension_numbers<[2], [2], [1], [1], [0, 0, 0, 1, 1, 1], [0], [0]>} : vector<2x8x8xbf16>, vector<2x8x8xbf16>, vector<2x8x8xf32> -> vector<2x8x8xf32>
    "tpu.trace_stop"() : () -> ()
    %cst_24 = arith.constant dense<0xFF800000> : vector<2x8xf32>
    %46 = vector.multi_reduction <maximumf>, %45, %cst_24 [2] : vector<2x8x8xf32> to vector<2x8xf32>
    %47 = vector.shape_cast %46 : vector<2x8xf32> to vector<2x8x1xf32>
    %48 = vector.broadcast %47 : vector<2x8x1xf32> to vector<2x8x8xf32>
    %49 = arith.subf %45, %48 : vector<2x8x8xf32>
    %50 = math.exp %49 : vector<2x8x8xf32>
    %cst_25 = arith.constant dense<0.000000e+00> : vector<2x8xf32>
    %51 = vector.multi_reduction <add>, %50, %cst_25 [2] : vector<2x8x8xf32> to vector<2x8xf32>
    %52 = vector.shape_cast %51 : vector<2x8xf32> to vector<2x8x1xf32>
    %53 = tpu.reciprocal %52 {approx = true} : vector<2x8x1xf32> -> vector<2x8x1xf32>
    %54 = vector.broadcast %53 : vector<2x8x1xf32> to vector<2x8x8xf32>
    %55 = arith.mulf %50, %54 : vector<2x8x8xf32>
    %56 = arith.truncf %55 : vector<2x8x8xf32> to vector<2x8x8xbf16>
    "tpu.trace_start"() <{level = 10 : i32, message = "bqk,bkd->bqd"}> : () -> ()
    %cst_26 = arith.constant dense<0.000000e+00> : vector<2x8x8xf32>
    %57 = tpu.matmul %56, %44, %cst_26 {dimension_numbers = #tpu.dot_dimension_numbers<[2], [1], [1], [2], [0, 0, 0, 1, 1, 2], [0], [0]>} : vector<2x8x8xbf16>, vector<2x8x8xbf16>, vector<2x8x8xf32> -> vector<2x8x8xf32>
    "tpu.trace_stop"() : () -> ()
    %c0_27 = arith.constant 0 : index
    %c0_28 = arith.constant 0 : index
    %c8 = arith.constant 8 : index
    %58 = vector.load %arg15[%c0_27, %c0_28, %c8] : memref<2x8x32xf32, #tpu.memory_space<vmem>>, vector<2x8x8xf32>
    tpu.vector_store %arg15[%c0_27, %c0_28, %c8], %57 {strides = array<i32>} : memref<2x8x32xf32, #tpu.memory_space<vmem>>, vector<2x8x8xf32>,
    %59 = vector.extract_strided_slice %20 {offsets = [0, 0, 16], sizes = [2, 8, 8], strides = [1, 1, 1]} : vector<2x8x32xbf16> to vector<2x8x8xbf16>
    %60 = vector.extract_strided_slice %22 {offsets = [0, 0, 16], sizes = [2, 8, 8], strides = [1, 1, 1]} : vector<2x8x32xbf16> to vector<2x8x8xbf16>
    %61 = vector.extract_strided_slice %24 {offsets = [0, 0, 16], sizes = [2, 8, 8], strides = [1, 1, 1]} : vector<2x8x32xbf16> to vector<2x8x8xbf16>
    "tpu.trace_start"() <{level = 10 : i32, message = "bqd,bkd->bqk"}> : () -> ()
    %cst_29 = arith.constant dense<0.000000e+00> : vector<2x8x8xf32>
    %62 = tpu.matmul %59, %60, %cst_29 {dimension_numbers = #tpu.dot_dimension_numbers<[2], [2], [1], [1], [0, 0, 0, 1, 1, 1], [0], [0]>} : vector<2x8x8xbf16>, vector<2x8x8xbf16>, vector<2x8x8xf32> -> vector<2x8x8xf32>
    "tpu.trace_stop"() : () -> ()
    %cst_30 = arith.constant dense<0xFF800000> : vector<2x8xf32>
    %63 = vector.multi_reduction <maximumf>, %62, %cst_30 [2] : vector<2x8x8xf32> to vector<2x8xf32>
    %64 = vector.shape_cast %63 : vector<2x8xf32> to vector<2x8x1xf32>
    %65 = vector.broadcast %64 : vector<2x8x1xf32> to vector<2x8x8xf32>
    %66 = arith.subf %62, %65 : vector<2x8x8xf32>
    %67 = math.exp %66 : vector<2x8x8xf32>
    %cst_31 = arith.constant dense<0.000000e+00> : vector<2x8xf32>
    %68 = vector.multi_reduction <add>, %67, %cst_31 [2] : vector<2x8x8xf32> to vector<2x8xf32>
    %69 = vector.shape_cast %68 : vector<2x8xf32> to vector<2x8x1xf32>
    %70 = tpu.reciprocal %69 {approx = true} : vector<2x8x1xf32> -> vector<2x8x1xf32>
    %71 = vector.broadcast %70 : vector<2x8x1xf32> to vector<2x8x8xf32>
    %72 = arith.mulf %67, %71 : vector<2x8x8xf32>
    %73 = arith.truncf %72 : vector<2x8x8xf32> to vector<2x8x8xbf16>
    "tpu.trace_start"() <{level = 10 : i32, message = "bqk,bkd->bqd"}> : () -> ()
    %cst_32 = arith.constant dense<0.000000e+00> : vector<2x8x8xf32>
    %74 = tpu.matmul %73, %61, %cst_32 {dimension_numbers = #tpu.dot_dimension_numbers<[2], [1], [1], [2], [0, 0, 0, 1, 1, 2], [0], [0]>} : vector<2x8x8xbf16>, vector<2x8x8xbf16>, vector<2x8x8xf32> -> vector<2x8x8xf32>
    "tpu.trace_stop"() : () -> ()
    %c0_33 = arith.constant 0 : index
    %c0_34 = arith.constant 0 : index
    %c16 = arith.constant 16 : index
    %75 = vector.load %arg15[%c0_33, %c0_34, %c16] : memref<2x8x32xf32, #tpu.memory_space<vmem>>, vector<2x8x8xf32>
    tpu.vector_store %arg15[%c0_33, %c0_34, %c16], %74 {strides = array<i32>} : memref<2x8x32xf32, #tpu.memory_space<vmem>>, vector<2x8x8xf32>,
    %76 = vector.extract_strided_slice %20 {offsets = [0, 0, 24], sizes = [2, 8, 8], strides = [1, 1, 1]} : vector<2x8x32xbf16> to vector<2x8x8xbf16>
    %77 = vector.extract_strided_slice %22 {offsets = [0, 0, 24], sizes = [2, 8, 8], strides = [1, 1, 1]} : vector<2x8x32xbf16> to vector<2x8x8xbf16>
    %78 = vector.extract_strided_slice %24 {offsets = [0, 0, 24], sizes = [2, 8, 8], strides = [1, 1, 1]} : vector<2x8x32xbf16> to vector<2x8x8xbf16>
    "tpu.trace_start"() <{level = 10 : i32, message = "bqd,bkd->bqk"}> : () -> ()
    %cst_35 = arith.constant dense<0.000000e+00> : vector<2x8x8xf32>
    %79 = tpu.matmul %76, %77, %cst_35 {dimension_numbers = #tpu.dot_dimension_numbers<[2], [2], [1], [1], [0, 0, 0, 1, 1, 1], [0], [0]>} : vector<2x8x8xbf16>, vector<2x8x8xbf16>, vector<2x8x8xf32> -> vector<2x8x8xf32>
    "tpu.trace_stop"() : () -> ()
    %cst_36 = arith.constant dense<0xFF800000> : vector<2x8xf32>
    %80 = vector.multi_reduction <maximumf>, %79, %cst_36 [2] : vector<2x8x8xf32> to vector<2x8xf32>
    %81 = vector.shape_cast %80 : vector<2x8xf32> to vector<2x8x1xf32>
    %82 = vector.broadcast %81 : vector<2x8x1xf32> to vector<2x8x8xf32>
    %83 = arith.subf %79, %82 : vector<2x8x8xf32>
    %84 = math.exp %83 : vector<2x8x8xf32>
    %cst_37 = arith.constant dense<0.000000e+00> : vector<2x8xf32>
    %85 = vector.multi_reduction <add>, %84, %cst_37 [2] : vector<2x8x8xf32> to vector<2x8xf32>
    %86 = vector.shape_cast %85 : vector<2x8xf32> to vector<2x8x1xf32>
    %87 = tpu.reciprocal %86 {approx = true} : vector<2x8x1xf32> -> vector<2x8x1xf32>
    %88 = vector.broadcast %87 : vector<2x8x1xf32> to vector<2x8x8xf32>
    %89 = arith.mulf %84, %88 : vector<2x8x8xf32>
    %90 = arith.truncf %89 : vector<2x8x8xf32> to vector<2x8x8xbf16>
    "tpu.trace_start"() <{level = 10 : i32, message = "bqk,bkd->bqd"}> : () -> ()
    %cst_38 = arith.constant dense<0.000000e+00> : vector<2x8x8xf32>
    %91 = tpu.matmul %90, %78, %cst_38 {dimension_numbers = #tpu.dot_dimension_numbers<[2], [1], [1], [2], [0, 0, 0, 1, 1, 2], [0], [0]>} : vector<2x8x8xbf16>, vector<2x8x8xbf16>, vector<2x8x8xf32> -> vector<2x8x8xf32>
    "tpu.trace_stop"() : () -> ()
    %c0_39 = arith.constant 0 : index
    %c0_40 = arith.constant 0 : index
    %c24 = arith.constant 24 : index
    %92 = vector.load %arg15[%c0_39, %c0_40, %c24] : memref<2x8x32xf32, #tpu.memory_space<vmem>>, vector<2x8x8xf32>
    tpu.vector_store %arg15[%c0_39, %c0_40, %c24], %91 {strides = array<i32>} : memref<2x8x32xf32, #tpu.memory_space<vmem>>, vector<2x8x8xf32>,
    %c0_41 = arith.constant 0 : index
    %c0_42 = arith.constant 0 : index
    %c0_43 = arith.constant 0 : index
    %93 = vector.load %arg15[%c0_41, %c0_42, %c0_43] : memref<2x8x32xf32, #tpu.memory_space<vmem>>, vector<2x8x32xf32>
    %94 = vector.shape_cast %93 : vector<2x8x32xf32> to vector<16x32xf32>
    %95 = arith.truncf %94 : vector<16x32xf32> to vector<16x32xbf16>
    %c0_44 = arith.constant 0 : index
    %c0_45 = arith.constant 0 : index
    %96 = vector.load %arg8[%c0_44, %c0_45] : memref<32x32xbf16, #tpu.memory_space<vmem>>, vector<32x32xbf16>
    %cst_46 = arith.constant dense<0.000000e+00> : vector<16x32xf32>
    %97 = tpu.matmul %95, %96, %cst_46 {dimension_numbers = #tpu.dot_dimension_numbers<[1], [0], [0], [1], [0, 0, 1, 1], [], []>} : vector<16x32xbf16>, vector<32x32xbf16>, vector<16x32xf32> -> vector<16x32xf32>
    %c0_47 = arith.constant 0 : index
    %c0_48 = arith.constant 0 : index
    %98 = vector.load %arg9[%c0_47, %c0_48] : memref<1x32xf32, #tpu.memory_space<vmem>>, vector<1x32xf32>
    %99 = vector.broadcast %98 : vector<1x32xf32> to vector<16x32xf32>
    %100 = arith.addf %97, %99 : vector<16x32xf32>
    %101 = arith.addf %0, %100 : vector<16x32xf32>
    %102 = arith.truncf %101 : vector<16x32xf32> to vector<16x32xbf16>
    %c0_49 = arith.constant 0 : index
    %c0_50 = arith.constant 0 : index
    %103 = vector.load %arg10[%c0_49, %c0_50] : memref<32x64xbf16, #tpu.memory_space<vmem>>, vector<32x64xbf16>
    %cst_51 = arith.constant dense<0.000000e+00> : vector<16x64xf32>
    %104 = tpu.matmul %102, %103, %cst_51 {dimension_numbers = #tpu.dot_dimension_numbers<[1], [0], [0], [1], [0, 0, 1, 1], [], []>} : vector<16x32xbf16>, vector<32x64xbf16>, vector<16x64xf32> -> vector<16x64xf32>
    %c0_52 = arith.constant 0 : index
    %c0_53 = arith.constant 0 : index
    %105 = vector.load %arg11[%c0_52, %c0_53] : memref<1x64xf32, #tpu.memory_space<vmem>>, vector<1x64xf32>
    %106 = vector.broadcast %105 : vector<1x64xf32> to vector<16x64xf32>
    %107 = arith.addf %104, %106 : vector<16x64xf32>
    %cst_54 = arith.constant 0.000000e+00 : f32
    %108 = vector.broadcast %cst_54 : f32 to vector<16x64xf32>
    %109 = arith.maximumf %107, %108 : vector<16x64xf32>
    %110 = arith.truncf %109 : vector<16x64xf32> to vector<16x64xbf16>
    %c0_55 = arith.constant 0 : index
    %c0_56 = arith.constant 0 : index
    %111 = vector.load %arg12[%c0_55, %c0_56] : memref<64x32xbf16, #tpu.memory_space<vmem>>, vector<64x32xbf16>
    %cst_57 = arith.constant dense<0.000000e+00> : vector<16x32xf32>
    %112 = tpu.matmul %110, %111, %cst_57 {dimension_numbers = #tpu.dot_dimension_numbers<[1], [0], [0], [1], [0, 0, 1, 1], [], []>} : vector<16x64xbf16>, vector<64x32xbf16>, vector<16x32xf32> -> vector<16x32xf32>
    %c0_58 = arith.constant 0 : index
    %c0_59 = arith.constant 0 : index
    %113 = vector.load %arg13[%c0_58, %c0_59] : memref<1x32xf32, #tpu.memory_space<vmem>>, vector<1x32xf32>
    %114 = vector.broadcast %113 : vector<1x32xf32> to vector<16x32xf32>
    %115 = arith.addf %112, %114 : vector<16x32xf32>
    %116 = arith.addf %101, %115 : vector<16x32xf32>
    %c0_60 = arith.constant 0 : index
    %c0_61 = arith.constant 0 : index
    %117 = vector.load %arg14[%c0_60, %c0_61] : memref<16x32xf32, #tpu.memory_space<vmem>>, vector<16x32xf32>
    tpu.vector_store %arg14[%c0_60, %c0_61], %116 {strides = array<i32>} : memref<16x32xf32, #tpu.memory_space<vmem>>, vector<16x32xf32>,
    return
  }
  func.func @transform_0(%arg0: i32) -> (i32, i32) {
    %c0_i32 = arith.constant 0 : i32
    %c0_i32_0 = arith.constant 0 : i32
    return %arg0, %c0_i32 : i32, i32
  }
  func.func @transform_1(%arg0: i32) -> (i32, i32) {
    %c0_i32 = arith.constant 0 : i32
    %c0_i32_0 = arith.constant 0 : i32
    %c0_i32_1 = arith.constant 0 : i32
    return %c0_i32, %c0_i32_0 : i32, i32
  }
  func.func @transform_2(%arg0: i32) -> (i32, i32) {
    %c0_i32 = arith.constant 0 : i32
    %c0_i32_0 = arith.constant 0 : i32
    %c0_i32_1 = arith.constant 0 : i32
    return %c0_i32, %c0_i32_0 : i32, i32
  }
  func.func @transform_3(%arg0: i32) -> (i32, i32) {
    %c0_i32 = arith.constant 0 : i32
    %c0_i32_0 = arith.constant 0 : i32
    %c0_i32_1 = arith.constant 0 : i32
    return %c0_i32, %c0_i32_0 : i32, i32
  }
  func.func @transform_4(%arg0: i32) -> (i32, i32) {
    %c0_i32 = arith.constant 0 : i32
    %c0_i32_0 = arith.constant 0 : i32
    %c0_i32_1 = arith.constant 0 : i32
    return %c0_i32, %c0_i32_0 : i32, i32
  }
  func.func @transform_5(%arg0: i32) -> (i32, i32) {
    %c0_i32 = arith.constant 0 : i32
    %c0_i32_0 = arith.constant 0 : i32
    %c0_i32_1 = arith.constant 0 : i32
    return %c0_i32, %c0_i32_0 : i32, i32
  }
  func.func @transform_6(%arg0: i32) -> (i32, i32) {
    %c0_i32 = arith.constant 0 : i32
    %c0_i32_0 = arith.constant 0 : i32
    %c0_i32_1 = arith.constant 0 : i32
    return %c0_i32, %c0_i32_0 : i32, i32
  }
  func.func @transform_7(%arg0: i32) -> (i32, i32) {
    %c0_i32 = arith.constant 0 : i32
    %c0_i32_0 = arith.constant 0 : i32
    %c0_i32_1 = arith.constant 0 : i32
    return %c0_i32, %c0_i32_0 : i32, i32
  }
  func.func @transform_8(%arg0: i32) -> (i32, i32) {
    %c0_i32 = arith.constant 0 : i32
    %c0_i32_0 = arith.constant 0 : i32
    %c0_i32_1 = arith.constant 0 : i32
    return %c0_i32, %c0_i32_0 : i32, i32
  }
  func.func @transform_9(%arg0: i32) -> (i32, i32) {
    %c0_i32 = arith.constant 0 : i32
    %c0_i32_0 = arith.constant 0 : i32
    %c0_i32_1 = arith.constant 0 : i32
    return %c0_i32, %c0_i32_0 : i32, i32
  }
  func.func @transform_10(%arg0: i32) -> (i32, i32) {
    %c0_i32 = arith.constant 0 : i32
    %c0_i32_0 = arith.constant 0 : i32
    %c0_i32_1 = arith.constant 0 : i32
    return %c0_i32, %c0_i32_0 : i32, i32
  }
  func.func @transform_11(%arg0: i32) -> (i32, i32) {
    %c0_i32 = arith.constant 0 : i32
    %c0_i32_0 = arith.constant 0 : i32
    %c0_i32_1 = arith.constant 0 : i32
    return %c0_i32, %c0_i32_0 : i32, i32
  }
  func.func @transform_12(%arg0: i32) -> (i32, i32) {
    %c0_i32 = arith.constant 0 : i32
    %c0_i32_0 = arith.constant 0 : i32
    %c0_i32_1 = arith.constant 0 : i32
    return %c0_i32, %c0_i32_0 : i32, i32
  }
  func.func @transform_13(%arg0: i32) -> (i32, i32) {
    %c0_i32 = arith.constant 0 : i32
    %c0_i32_0 = arith.constant 0 : i32
    return %arg0, %c0_i32 : i32, i32
  }
}

</mosaic_0001>

<bundles_post_ra>
// kernel: tpu_custom_call.1
= control target key start
LH: loop header
LB: loop body
LE: loop exit
PB: predicated region body
PF: predicated region fallthrough
CT: control target
= control target key end

     0   :  { %18 = vsyncpa [#allocation4], 0  ;;  %s2300_s0 = inlined_call_operand.vmem [shape: f32[16,32], index: 0, kind: input, shape index: {}]   ;;  %s2301_s1 = inlined_call_operand.vmem [shape: bf16[32,32], index: 1, kind: input, shape index: {}]   ;;  %s2302_s2 = inlined_call_operand.vmem [shape: bf16[32,32], index: 2, kind: input, shape index: {}]   ;;  %s2303_s3 = inlined_call_operand.hbm [shape: bf16[32,32], index: 3, kind: input, shape index: {}]   ;;  %s2304_s4 = inlined_call_operand.hbm [shape: f32[1,32], index: 4, kind: input, shape index: {}]   ;;  %s2305_s5 = inlined_call_operand.hbm [shape: f32[1,32], index: 5, kind: input, shape index: {}]   ;;  %s2306_s6 = inlined_call_operand.hbm [shape: f32[1,32], index: 6, kind: input, shape index: {}]   ;;  %s2307_s7 = inlined_call_operand.hbm [shape: bf16[32,32], index: 7, kind: input, shape index: {}]   ;;  %s2308_s8 = inlined_call_operand.hbm [shape: f32[1,32], index: 8, kind: input, shape index: {}]   ;;  %s2309_s9 = inlined_call_operand.vmem [shape: bf16[32,64], index: 9, kind: input, shape index: {}]   ;;  %s2310_s10 = inlined_call_operand.vmem [shape: f32[1,64], index: 10, kind: input, shape index: {}]   ;;  %s2311_s11 = inlined_call_operand.vmem [shape: bf16[64,32], index: 11, kind: input, shape index: {}]   ;;  %s2312_s12 = inlined_call_operand.vmem [shape: f32[1,32], index: 12, kind: input, shape index: {}]   ;;  %s2313_s13 = inlined_call_operand.hbm [shape: f32[16,32], index: 13, kind: output, shape index: {}]  }
   0x1   :  { %19 = vsyncpa [#allocation7], 0 }
   0x2   :  { %20 = vsyncpa [#allocation10], 0 }
   0x3   :  { %21 = vsyncpa [#allocation13], 0 }
   0x4   :  { %22 = vsyncpa [#allocation5], 0  ;;  %s1945_s25 = smov [#allocation6]   ;;  %s1946_s27 = smov [#allocation9]  }
   0x5   :  { %s47_s26 = sshll.u32 %s1945_s25, 4  ;;  %s67_s28 = sshll.u32 %s1946_s27, 4  ;;  %s48_s26 = int_to_ptr.vmem [resolvable:$true] %s47_s26  ;;  %s68_s28 = int_to_ptr.vmem [resolvable:$true] %s67_s28 }
   0x6   :  { %s1803_s29 = scalar_lea.vmem %s48_s26, 16  ;;  %s1807_s30 = scalar_lea.vmem %s48_s26, 32 }
   0x7   :  { %p1804_p0 = scmp.ne.s32.totalorder %s48_s26, %s1803_s29  ;;  %p1808_p1 = scmp.lt.s32.totalorder %s48_s26, %s48_s26 }
   0x8   :  { %p1809_p2 = scmp.lt.s32.totalorder %s1807_s30, %s1803_s29 }
   0xa   :  { %p1810_p3 = por %p1809_p2, %p1808_p1 }
   0xc   :  { %p1811_p4 = pnand %p1810_p3, %p1804_p0 }
   0xe   :  { %1814 = shalt.err (!%p1811_p4)
}
   0xf   :  { %50 = dma.hbm_to_vmem [thread:$0]  %s2304_s4, 16, %s48_s26, [#allocation7]  }
  0x10   :  { %s1823_s16 = scalar_lea.vmem %s68_s28, 16  ;;  %s1827_s17 = scalar_lea.vmem %s68_s28, 32 }
  0x11   :  { %p1824_p5 = scmp.ne.s32.totalorder %s68_s28, %s1823_s16  ;;  %p1828_p6 = scmp.lt.s32.totalorder %s68_s28, %s68_s28 }
  0x12   :  { %p1829_p7 = scmp.lt.s32.totalorder %s1827_s17, %s1823_s16 }
  0x14   :  { %p1830_p8 = por %p1829_p7, %p1828_p6 }
  0x16   :  { %p1831_p9 = pnand %p1830_p8, %p1824_p5 }
  0x18   :  { %1834 = shalt.err (!%p1831_p9)
}
  0x19   :  { %70 = dma.hbm_to_vmem [thread:$0]  %s2306_s6, 16, %s68_s28, [#allocation10]  }
  0x1a   :  { %s1947_s20 = smov [#allocation3]  }
  0x1b   :  { %s34_s21 = sshll.u32 %s1947_s20, 4  ;;  %s35_s21 = int_to_ptr.vmem [resolvable:$true] %s34_s21 }
  0x1c   :  { %s1843_s22 = scalar_lea.vmem %s35_s21, 256  ;;  %p1848_p11 = scmp.lt.s32.totalorder %s35_s21, %s35_s21 }
  0x1d   :  { %p1844_p10 = scmp.ne.s32.totalorder %s35_s21, %s1843_s22  ;;  %p1849_p12 = scmp.lt.s32.totalorder %s1843_s22, %s1843_s22 }
  0x1f   :  { %p1850_p13 = por %p1849_p12, %p1848_p11 }
  0x21   :  { %p1851_p0 = pnand %p1850_p13, %p1844_p10 }
  0x23   :  { %1854 = shalt.err (!%p1851_p0)
}
  0x24   :  { %s1948_s4 = smov 64   ;;  %s1949_s23 = smov 4  }
  0x25   :  { %40 = dma.hbm_to_vmem [thread:$0]  %s2303_s3, 256, %s35_s21, [#allocation4], %s1948_s4, %s1948_s4, %s1949_s23  }
  0x26   :  { %s1950_s26 = smov [#allocation8]   ;;  %s1951_s6 = smov [#allocation11]  }
  0x27   :  { %s57_s27 = sshll.u32 %s1950_s26, 4  ;;  %s76_s28 = sshll.u32 %s1951_s6, 4  ;;  %s58_s27 = int_to_ptr.vmem [resolvable:$true] %s57_s27  ;;  %s77_s28 = int_to_ptr.vmem [resolvable:$true] %s76_s28 }
  0x28   :  { %s1863_s29 = scalar_lea.vmem %s58_s27, 16  ;;  %s1867_s30 = scalar_lea.vmem %s58_s27, 32 }
  0x29   :  { %p1864_p1 = scmp.ne.s32.totalorder %s58_s27, %s1863_s29  ;;  %p1868_p2 = scmp.lt.s32.totalorder %s58_s27, %s58_s27 }
  0x2a   :  { %p1869_p3 = scmp.lt.s32.totalorder %s1867_s30, %s1863_s29 }
  0x2c   :  { %p1870_p4 = por %p1869_p3, %p1868_p2 }
  0x2e   :  { %p1871_p5 = pnand %p1870_p4, %p1864_p1 }
  0x30   :  { %1874 = shalt.err (!%p1871_p5)
}
  0x31   :  { %60 = dma.hbm_to_vmem [thread:$0]  %s2305_s5, 16, %s58_s27, [#allocation7]  }
  0x32   :  { %s1883_s16 = scalar_lea.vmem %s77_s28, 256  ;;  %p1888_p7 = scmp.lt.s32.totalorder %s77_s28, %s77_s28 }
  0x33   :  { %p1884_p6 = scmp.ne.s32.totalorder %s77_s28, %s1883_s16  ;;  %p1889_p8 = scmp.lt.s32.totalorder %s1883_s16, %s1883_s16 }
  0x35   :  { %p1890_p9 = por %p1889_p8, %p1888_p7 }
  0x37   :  { %p1891_p10 = pnand %p1890_p9, %p1884_p6 }
  0x39   :  { %1894 = shalt.err (!%p1891_p10)
}
  0x3a   :  { %82 = dma.hbm_to_vmem [thread:$0]  %s2307_s7, 256, %s77_s28, [#allocation10], %s1948_s4, %s1948_s4, %s1949_s23  }
  0x3b   :  { %s1952_s18 = smov [#allocation12]  }
  0x3c   :  { %s89_s19 = sshll.u32 %s1952_s18, 4  ;;  %s90_s19 = int_to_ptr.vmem [resolvable:$true] %s89_s19 }
  0x3d   :  { %s1903_s20 = scalar_lea.vmem %s90_s19, 16  ;;  %s1907_s21 = scalar_lea.vmem %s90_s19, 32 }
  0x3e   :  { %p1904_p11 = scmp.ne.s32.totalorder %s90_s19, %s1903_s20  ;;  %p1908_p12 = scmp.lt.s32.totalorder %s90_s19, %s90_s19 }
  0x3f   :  { %p1909_p13 = scmp.lt.s32.totalorder %s1907_s21, %s1903_s20 }
  0x41   :  { %p1910_p0 = por %p1909_p13, %p1908_p12 }
  0x43   :  { %p1911_p1 = pnand %p1910_p0, %p1904_p11 }
  0x45   :  { %1914 = shalt.err (!%p1911_p1)
}
  0x46   :  { %92 = dma.hbm_to_vmem [thread:$0]  %s2308_s8, 16, %s90_s19, [#allocation13]  }
  0x47   :  { %1935 = dma.done.wait [#allocation4], 256  }
  0x48   :  { %1936 = vsyncadd [#allocation4], 4294967040 }
  0x49   :  { %1937 = dma.done.wait [#allocation7], 32  }
  0x4a   :  { %1938 = vsyncadd [#allocation7], 4294967264 }
  0x4b   :  { %1939 = dma.done.wait [#allocation10], 272  }
  0x4c   :  { %1940 = vsyncadd [#allocation10], 4294967024 }
  0x4d   :  { %1941 = dma.done.wait [#allocation13], 16  }
  0x4e   :  { %1942 = vsyncadd [#allocation13], 4294967280  ;;  %v1953_v0 = vmov 0.0   ;;  %vm1954_vm0 = vmmov 0   ;;  %v1749_v1 = vld [vmem:[%s2302_s2 + $0x8] sm:$0xff]   ;;  %v1751_v3 = vld [vmem:[%s2302_s2] sm:$0xff]  }
  0x4f   :  { %1591 = vmatprep.subr.bf16.mxu1 %v1953_v0  ;;  %1583 = vmatprep.subr.bf16.mxu0 %v1953_v0  ;;  %v1750_v2 = vld [vmem:[%s2301_s1 + $0x8] sm:$0xff]   ;;  %v1752_v4 = vld [vmem:[%s2301_s1] sm:$0xff]   ;;  %vm146_vm1 = vcmask 261120   ;;  %v1753_v8 = vld [vmem:[#allocation3 + $0x8] sm:$0xff]   ;;  %vm327_vm2 = vcmask 64512   ;;  %vm447_vm3 = vcmask 1043456  }
  0x50   :  { %1595 = vmatprep.mubr.msk.bf16.mxu1 %vm1954_vm0, %v1953_v0  ;;  %1587 = vmatprep.mubr.msk.bf16.mxu0 %vm1954_vm0, %v1953_v0  ;;  %v2074_v5 = vld [vmem:[%s2300_s0] sm:$0xff]  ;;  %v2079_v6 = vld [vmem:[%s2300_s0 + $0x8] sm:$0xff]  ;;  %v1754_v9 = vld [vmem:[#allocation3] sm:$0xff]   ;;  %s1955_s0 = smov 120   ;;  %s1956_s1 = smov 112   ;;  %vm773_vm4 = vcmask 130112  }
  0x51   :  { %1592 = vmatpush3.bf16.msra.mxu1 %v1749_v1  ;;  %1584 = vmatpush3.bf16.msra.mxu0 %v1750_v2  ;;  %v122_v7 = vpack.c.bf16 %v2079_v6, %v2074_v5  ;;  %v1493_v10 = vld [vmem:[#allocation8] ss:$0 sm:$0xff]  ;;  %v1489_v11 = vld [vmem:[#allocation6] ss:$0 sm:$0xff]  ;;  %v1497_v32 = vld [vmem:[#allocation9] ss:$0 sm:$0xff] }
  0x52   :  { %1593 = vmatprep.subr.bf16.mxu1 %v1953_v0  ;;  %1585 = vmatprep.subr.bf16.mxu0 %v1953_v0  ;;  %s1957_s2 = smov 104   ;;  %s1958_s14 = smov 8   ;;  %vm1004_vm5 = vcmask 195712   ;;  %vm1235_vm6 = vcmask 261312   ;;  %vm1420_vm7 = vcmask 523264  }
  0x53   :  { %s1959_s15 = smov 16   ;;  %s1960_s16 = smov 24  }
  0x55   :  { %1594 = vmatpush3.bf16.msra.mxu1 %v1751_v3  ;;  %1586 = vmatpush3.bf16.msra.mxu0 %v1752_v4 }
  0x56   :  { %1607 = vmatprep.subr.bf16.mxu1 %v1953_v0  ;;  %1599 = vmatprep.subr.bf16.mxu0 %v1953_v0 }
  0x58   :  { %1596 = vmatmul.mubr.msk.bf16.vlgmr.msra.gmra.mxu1 %vm146_vm1, %v122_v7  ;;  %1588 = vmatmul.mubr.msk.bf16.vlgmr.msra.gmra.mxu0 %vm146_vm1, %v122_v7 }
  0x59   :  { %1609 = vmatprep.mubr.msk.bf16.mxu1 %vm1954_vm0, %v1953_v0  ;;  %1600 = vmatpush3.bf16.msra.mxu0 %v1753_v8 }
  0x5a   :  { %1603 = vmatprep.mubr.msk.bf16.mxu0 %vm1954_vm0, %v1953_v0  ;;  %1601 = vmatprep.subr.bf16.mxu0 %v1953_v0 }
  0x5d   :  { %1602 = vmatpush3.bf16.msra.mxu0 %v1754_v9 }
  0x5e   :  { %1613 = vmatprep.subr.bf16.mxu0 %v1953_v0 }
  0x60   :  { %1604 = vmatmul.mubr.msk.bf16.vlgmr.msra.gmra.mxu0 %vm146_vm1, %v122_v7 }
  0x61   :  { %1615 = vmatprep.mubr.msk.bf16.mxu0 %vm1954_vm0, %v1953_v0 }
 0x118   :  { %v248_v12 = vpop.f32.mrf.mxu1  ;;  %v184_v14 = vpop.f32.mrf.mxu0 }
 0x119   :  { %v249_v13 = vadd.f32 %v1493_v10, %v248_v12  ;;  %v185_v15 = vadd.f32 %v1489_v11, %v184_v14 }
 0x11a   :  { %v1597_v16 = vpop.f32.mrf.mxu1  ;;  %v1589_v18 = vpop.f32.mrf.mxu0 }
 0x11b   :  { %v2096_v17 = vpack.c.bf16 %v249_v13, %v249_v13  ;;  %v319_v20 = vmul.f32 0.35355338, %v185_v15 }
 0x11c   :  { %v251_v19 = vpop.f32.mrf.mxu1  ;;  %v187_v22 = vpop.f32.mrf.mxu0 }
 0x11d   :  { %v252_v21 = vadd.f32 %v1493_v10, %v251_v19  ;;  %v332_v23 = vsel %vm327_vm2, %v2096_v17, 0  ;;  %v188_v26 = vadd.f32 %v1489_v11, %v187_v22  ;;  %v2103_v28 = vpack.c.bf16 %v319_v20, %v319_v20 }
 0x11e   :  { %v1598_v24 = vpop.f32.mrf.mxu1  ;;  %1608 = vmatpush3.bf16.xpose.msra.mxu1 %v332_v23  ;;  %v1590_v27 = vpop.f32.mrf.mxu0 }
 0x11f   :  { %v2100_v25 = vpack.c.bf16 %v252_v21, %v252_v21  ;;  %1619 = vmatprep.subr.bf16.mxu1 %v1953_v0  ;;  %v320_v30 = vmul.f32 0.35355338, %v188_v26 }
 0x120   :  { %v312_v33 = vpop.f32.mrf.mxu0 }
 0x121   :  { %595 = vrot.lane.b32.xlu1 %v2100_v25, %s1955_s0  ;;  %v378_v29 = vsel %vm327_vm2, %v2100_v25, 0  ;;  %v2114_v31 = vpack.c.bf16 %v320_v30, %v320_v30  ;;  %v313_v35 = vadd.f32 %v1497_v32, %v312_v33 }
 0x122   :  { %1614 = vmatpush3.bf16.xpose.msra.mxu0 %v378_v29  ;;  %v1605_v34 = vpop.f32.mrf.mxu0 }
 0x123   :  { %1625 = vmatprep.subr.bf16.mxu0 %v1953_v0  ;;  %v2120_v39 = vpack.c.bf16 %v313_v35, %v313_v35 }
 0x124   :  { %v315_v36 = vpop.f32.mrf.mxu0 }
 0x125   :  { %1610 = vmatmul.mubr.msk.bf16.vlgmr.msra.gmra.mxu1 %vm327_vm2, %v2103_v28  ;;  %v316_v37 = vadd.f32 %v1497_v32, %v315_v36  ;;  %v449_v41 = vsel %vm447_vm3, %v2120_v39, 0 }
 0x126   :  { %1621 = vmatprep.mubr.msk.bf16.mxu1 %vm1954_vm0, %v1953_v0  ;;  %v1606_v38 = vpop.f32.mrf.mxu0  ;;  %1620 = vmatpush3.bf16.msra.mxu1 %v449_v41 }
 0x127   :  { %v2122_v40 = vpack.c.bf16 %v316_v37, %v316_v37  ;;  %1631 = vmatprep.subr.bf16.mxu1 %v1953_v0 }
 0x129   :  { %1616 = vmatmul.mubr.msk.bf16.vlgmr.msra.gmra.mxu0 %vm327_vm2, %v2114_v31  ;;  %v495_v42 = vsel %vm447_vm3, %v2122_v40, 0 }
 0x12a   :  { %1627 = vmatprep.mubr.msk.bf16.mxu0 %vm1954_vm0, %v1953_v0  ;;  %1626 = vmatpush3.bf16.msra.mxu0 %v495_v42 }
 0x12b   :  { %1637 = vmatprep.subr.bf16.mxu0 %v1953_v0 }
 0x193   :  { %v596_v63 = vpop.permute.xlu1 %595 }
 0x194   :  { %v601_v13 = vsel %vm327_vm2, %v596_v63, 0 }
 0x1e5   :  { %v368_v43 = vpop.f32.mrf.mxu1 }
 0x1e6   :  { %v420_v44 = vsel %vm327_vm2, %v368_v43, -inf }
 0x1e7   :  { %421 = vmax.xlane.f32.xlu0 %v420_v44  ;;  %v1611_v45 = vpop.f32.mrf.mxu1 }
 0x1e9   :  { %v371_v46 = vpop.f32.mrf.mxu1  ;;  %v414_v47 = vpop.f32.mrf.mxu0 }
 0x1ea   :  { %v423_v48 = vsel %vm327_vm2, %v414_v47, -inf }
 0x1eb   :  { %v1612_v49 = vpop.f32.mrf.mxu1  ;;  %424 = vmax.xlane.f32.xlu0 %v423_v48  ;;  %v1617_v50 = vpop.f32.mrf.mxu0 }
 0x1ed   :  { %v417_v51 = vpop.f32.mrf.mxu0 }
 0x1ef   :  { %v1618_v52 = vpop.f32.mrf.mxu0 }
 0x201   :  { %543 = vrot.lane.b32.xlu0 %v2096_v17, %s1955_s0 }
 0x270   :  { %v422_v53 = vpop.xlane.xlu0 %421 }
 0x271   :  { %v426_v54 = vsub.f32 %v368_v43, %v422_v53 }
 0x273   :  { %v428_v55 = vmul.f32 1.442695, %v426_v54 }
 0x274   :  { %v425_v56 = vpop.xlane.xlu0 %424 }
 0x275   :  { %1763 = vpow2.f32 %v428_v55  ;;  %v427_v57 = vsub.f32 %v414_v47, %v425_v56 }
 0x277   :  { %v430_v58 = vmul.f32 1.442695, %v427_v57 }
 0x278   :  { %v544_v7 = vpop.permute.xlu0 %543 }
 0x279   :  { %1765 = vpow2.f32 %v430_v58  ;;  %v549_v10 = vsel %vm327_vm2, %v544_v7, 0 }
 0x282   :  { %v1764_v59 = vpop.eup %1763 }
 0x283   :  { %v432_v60 = vsel %vm327_vm2, %v1764_v59, 0.0 }
 0x284   :  { %433 = vadd.xlane.f32.xlu1 %v432_v60 }
 0x286   :  { %v1766_v61 = vpop.eup %1765 }
 0x287   :  { %v435_v62 = vsel %vm327_vm2, %v1766_v61, 0.0 }
 0x288   :  { %436 = vadd.xlane.f32.xlu1 %v435_v62 }
 0x299   :  { %540 = vrot.lane.b32.xlu1 %v2103_v28, %s1955_s0 }
 0x29d   :  { %592 = vrot.lane.b32.xlu1 %v2114_v31, %s1955_s0 }
 0x30d   :  { %v434_v1 = vpop.xlane.xlu1 %433 }
 0x30e   :  { %1767 = vrcp.f32 %v434_v1 }
 0x311   :  { %v437_v2 = vpop.xlane.xlu1 %436 }
 0x312   :  { %1769 = vrcp.f32 %v437_v2 }
 0x315   :  { %v541_v14 = vpop.permute.xlu1 %540 }
 0x319   :  { %v593_v15 = vpop.permute.xlu1 %592 }
 0x31b   :  { %v1768_v3 = vpop.eup %1767 }
 0x31c   :  { %v440_v4 = vmul.f32 %v1768_v3, %v1764_v59 }
 0x31e   :  { %v442_v8 = vpack.c.bf16 %v440_v4, %v440_v4 }
 0x31f   :  { %v1770_v9 = vpop.eup %1769 }
 0x320   :  { %1622 = vmatmul.mubr.msk.bf16.vlgmr.msra.gmra.mxu1 %vm327_vm2, %v442_v8  ;;  %v441_v11 = vmul.f32 %v1770_v9, %v1766_v61 }
 0x321   :  { %1632 = vmatpush3.bf16.xpose.msra.mxu1 %v549_v10  ;;  %1633 = vmatprep.mubr.msk.bf16.mxu1 %vm1954_vm0, %v1953_v0 }
 0x322   :  { %v443_v12 = vpack.c.bf16 %v441_v11, %v441_v11  ;;  %1643 = vmatprep.subr.bf16.mxu1 %v1953_v0 }
 0x324   :  { %1628 = vmatmul.mubr.msk.bf16.vlgmr.msra.gmra.mxu0 %vm327_vm2, %v443_v12 }
 0x325   :  { %1638 = vmatpush3.bf16.xpose.msra.mxu0 %v601_v13  ;;  %1639 = vmatprep.mubr.msk.bf16.mxu0 %vm1954_vm0, %v1953_v0 }
 0x326   :  { %1649 = vmatprep.subr.bf16.mxu0 %v1953_v0 }
 0x328   :  { %1634 = vmatmul.mubr.msk.bf16.vlgmr.msra.gmra.mxu1 %vm327_vm2, %v541_v14 }
 0x329   :  { %1645 = vmatprep.mubr.msk.bf16.mxu1 %vm1954_vm0, %v1953_v0 }
 0x32c   :  { %1640 = vmatmul.mubr.msk.bf16.vlgmr.msra.gmra.mxu0 %vm327_vm2, %v593_v15 }
 0x32d   :  { %1651 = vmatprep.mubr.msk.bf16.mxu0 %vm1954_vm0, %v1953_v0 }
 0x3e0   :  { %v485_v16 = vpop.f32.mrf.mxu1 }
 0x3e1   :  { %537 = vst.msk [vmem:[#allocation2] sm:$0xff] %vm327_vm2, %v485_v16 }
 0x3e2   :  { %v1623_v18 = vpop.f32.mrf.mxu1 }
 0x3e4   :  { %v488_v19 = vpop.f32.mrf.mxu1  ;;  %v531_v20 = vpop.f32.mrf.mxu0 }
 0x3e5   :  { %538 = vst.msk [vmem:[#allocation2 + $0x8] sm:$0xff] %vm327_vm2, %v531_v20 }
 0x3e6   :  { %v1624_v21 = vpop.f32.mrf.mxu1  ;;  %v1629_v22 = vpop.f32.mrf.mxu0 }
 0x3e8   :  { %v534_v23 = vpop.f32.mrf.mxu0  ;;  %v585_v24 = vpop.f32.mrf.mxu1 }
 0x3e9   :  { %v643_v26 = vsel %vm327_vm2, %v585_v24, -inf }
 0x3ea   :  { %644 = vmax.xlane.f32.xlu0 %v643_v26  ;;  %v1630_v27 = vpop.f32.mrf.mxu0  ;;  %v1635_v29 = vpop.f32.mrf.mxu1 }
 0x3ec   :  { %v588_v30 = vpop.f32.mrf.mxu1  ;;  %v637_v32 = vpop.f32.mrf.mxu0 }
 0x3ed   :  { %v646_v33 = vsel %vm327_vm2, %v637_v32, -inf }
 0x3ee   :  { %v1636_v34 = vpop.f32.mrf.mxu1  ;;  %647 = vmax.xlane.f32.xlu1 %v646_v33  ;;  %v1641_v35 = vpop.f32.mrf.mxu0 }
 0x3f0   :  { %v640_v36 = vpop.f32.mrf.mxu0 }
 0x3f2   :  { %v1642_v37 = vpop.f32.mrf.mxu0 }
 0x3ff   :  { %717 = vrot.lane.b32.xlu1 %v2122_v40, %s1955_s0 }
 0x403   :  { %778 = vrot.lane.b32.xlu1 %v2096_v17, %s1956_s1 }
 0x407   :  { %828 = vrot.lane.b32.xlu1 %v2100_v25, %s1956_s1 }
 0x40b   :  { %826 = vrot.lane.b32.xlu1 %v2114_v31, %s1956_s1 }
 0x473   :  { %v645_v38 = vpop.xlane.xlu0 %644 }
 0x474   :  { %v649_v41 = vsub.f32 %v585_v24, %v645_v38 }
 0x476   :  { %v651_v42 = vmul.f32 1.442695, %v649_v41 }
 0x477   :  { %v648_v43 = vpop.xlane.xlu1 %647 }
 0x478   :  { %1771 = vpow2.f32 %v651_v42  ;;  %v650_v44 = vsub.f32 %v637_v32, %v648_v43 }
 0x47a   :  { %v653_v45 = vmul.f32 1.442695, %v650_v44 }
 0x47b   :  { %v718_v46 = vpop.permute.xlu1 %717 }
 0x47c   :  { %1773 = vpow2.f32 %v653_v45  ;;  %v723_v47 = vsel %vm447_vm3, %v718_v46, 0 }
 0x47d   :  { %1650 = vmatpush3.bf16.msra.mxu0 %v723_v47 }
 0x47e   :  { %1661 = vmatprep.subr.bf16.mxu0 %v1953_v0 }
 0x47f   :  { %v779_v57 = vpop.permute.xlu1 %778 }
 0x480   :  { %v784_v61 = vsel %vm327_vm2, %v779_v57, 0 }
 0x483   :  { %v829_v63 = vpop.permute.xlu1 %828 }
 0x484   :  { %v834_v2 = vsel %vm327_vm2, %v829_v63, 0 }
 0x485   :  { %v1772_v48 = vpop.eup %1771 }
 0x486   :  { %v655_v49 = vsel %vm327_vm2, %v1772_v48, 0.0 }
 0x487   :  { %656 = vadd.xlane.f32.xlu0 %v655_v49  ;;  %v827_v4 = vpop.permute.xlu1 %826 }
 0x489   :  { %v1774_v50 = vpop.eup %1773 }
 0x48a   :  { %v658_v51 = vsel %vm327_vm2, %v1774_v50, 0.0 }
 0x48b   :  { %659 = vadd.xlane.f32.xlu0 %v658_v51 }
 0x4a1   :  { %668 = vrot.lane.b32.xlu0 %v2120_v39, %s1955_s0 }
 0x4a5   :  { %776 = vrot.lane.b32.xlu0 %v2103_v28, %s1956_s1 }
 0x510   :  { %v657_v52 = vpop.xlane.xlu0 %656 }
 0x511   :  { %1775 = vrcp.f32 %v657_v52 }
 0x514   :  { %v660_v53 = vpop.xlane.xlu0 %659 }
 0x515   :  { %1777 = vrcp.f32 %v660_v53 }
 0x518   :  { %v669_v54 = vpop.permute.xlu0 %668 }
 0x519   :  { %v674_v55 = vsel %vm447_vm3, %v669_v54, 0 }
 0x51a   :  { %1644 = vmatpush3.bf16.msra.mxu1 %v674_v55 }
 0x51b   :  { %1655 = vmatprep.subr.bf16.mxu1 %v1953_v0 }
 0x51c   :  { %v777_v3 = vpop.permute.xlu0 %776 }
 0x51e   :  { %v1776_v56 = vpop.eup %1775 }
 0x51f   :  { %v663_v58 = vmul.f32 %v1776_v56, %v1772_v48 }
 0x521   :  { %v665_v59 = vpack.c.bf16 %v663_v58, %v663_v58 }
 0x522   :  { %v1778_v60 = vpop.eup %1777 }
 0x523   :  { %1646 = vmatmul.mubr.msk.bf16.vlgmr.msra.gmra.mxu1 %vm327_vm2, %v665_v59  ;;  %v664_v62 = vmul.f32 %v1778_v60, %v1774_v50 }
 0x524   :  { %1656 = vmatpush3.bf16.xpose.msra.mxu1 %v784_v61  ;;  %1657 = vmatprep.mubr.msk.bf16.mxu1 %vm1954_vm0, %v1953_v0 }
 0x525   :  { %v666_v1 = vpack.c.bf16 %v664_v62, %v664_v62  ;;  %1667 = vmatprep.subr.bf16.mxu1 %v1953_v0 }
 0x527   :  { %1652 = vmatmul.mubr.msk.bf16.vlgmr.msra.gmra.mxu0 %vm327_vm2, %v666_v1 }
 0x528   :  { %1662 = vmatpush3.bf16.xpose.msra.mxu0 %v834_v2  ;;  %1663 = vmatprep.mubr.msk.bf16.mxu0 %vm1954_vm0, %v1953_v0 }
 0x529   :  { %1673 = vmatprep.subr.bf16.mxu0 %v1953_v0 }
 0x52b   :  { %1658 = vmatmul.mubr.msk.bf16.vlgmr.msra.gmra.mxu1 %vm327_vm2, %v777_v3 }
 0x52c   :  { %1669 = vmatprep.mubr.msk.bf16.mxu1 %vm1954_vm0, %v1953_v0 }
 0x52f   :  { %1664 = vmatmul.mubr.msk.bf16.vlgmr.msra.gmra.mxu0 %vm327_vm2, %v827_v4 }
 0x530   :  { %1675 = vmatprep.mubr.msk.bf16.mxu0 %vm1954_vm0, %v1953_v0 }
 0x5e3   :  { %v2194_v7 = vpop.f32.mrf.mxu1 }
 0x5e5   :  { %v1647_v8 = vpop.f32.mrf.mxu1 }
 0x5e7   :  { %v713_v9 = vpop.f32.mrf.mxu1  ;;  %v2196_v10 = vpop.f32.mrf.mxu0 }
 0x5e9   :  { %v1648_v11 = vpop.f32.mrf.mxu1  ;;  %v1653_v12 = vpop.f32.mrf.mxu0 }
 0x5eb   :  { %v762_v13 = vpop.f32.mrf.mxu0  ;;  %v820_v14 = vpop.f32.mrf.mxu1 }
 0x5ec   :  { %v876_v15 = vsel %vm327_vm2, %v820_v14, -inf }
 0x5ed   :  { %877 = vmax.xlane.f32.xlu0 %v876_v15  ;;  %v1654_v16 = vpop.f32.mrf.mxu0  ;;  %v1659_v18 = vpop.f32.mrf.mxu1 }
 0x5ef   :  { %v823_v19 = vpop.f32.mrf.mxu1  ;;  %v870_v20 = vpop.f32.mrf.mxu0 }
 0x5f0   :  { %v879_v21 = vsel %vm327_vm2, %v870_v20, -inf }
 0x5f1   :  { %v1660_v22 = vpop.f32.mrf.mxu1  ;;  %880 = vmax.xlane.f32.xlu1 %v879_v21  ;;  %v1665_v23 = vpop.f32.mrf.mxu0 }
 0x5f3   :  { %v873_v24 = vpop.f32.mrf.mxu0 }
 0x5f5   :  { %v1666_v26 = vpop.f32.mrf.mxu0 }
 0x602   :  { %948 = vrot.lane.b32.xlu1 %v2122_v40, %s1956_s1 }
 0x606   :  { %1009 = vrot.lane.b32.xlu1 %v2096_v17, %s1957_s2 }
 0x60a   :  { %1059 = vrot.lane.b32.xlu1 %v2100_v25, %s1957_s2 }
 0x60e   :  { %1057 = vrot.lane.b32.xlu1 %v2114_v31, %s1957_s2 }
 0x676   :  { %v878_v27 = vpop.xlane.xlu0 %877 }
 0x677   :  { %v882_v29 = vsub.f32 %v820_v14, %v878_v27 }
 0x679   :  { %v884_v30 = vmul.f32 1.442695, %v882_v29 }
 0x67a   :  { %v881_v32 = vpop.xlane.xlu1 %880 }
 0x67b   :  { %1779 = vpow2.f32 %v884_v30  ;;  %v883_v33 = vsub.f32 %v870_v20, %v881_v32 }
 0x67d   :  { %v886_v34 = vmul.f32 1.442695, %v883_v33 }
 0x67e   :  { %v949_v35 = vpop.permute.xlu1 %948 }
 0x67f   :  { %1781 = vpow2.f32 %v886_v34  ;;  %v954_v36 = vsel %vm447_vm3, %v949_v35, 0 }
 0x680   :  { %1674 = vmatpush3.bf16.msra.mxu0 %v954_v36 }
 0x681   :  { %1685 = vmatprep.subr.bf16.mxu0 %v1953_v0 }
 0x682   :  { %v1010_v45 = vpop.permute.xlu1 %1009 }
 0x683   :  { %v1015_v49 = vsel %vm327_vm2, %v1010_v45, 0 }
 0x686   :  { %v1060_v50 = vpop.permute.xlu1 %1059 }
 0x687   :  { %v1065_v52 = vsel %vm327_vm2, %v1060_v50, 0 }
 0x688   :  { %v1780_v17 = vpop.eup %1779 }
 0x689   :  { %v888_v25 = vsel %vm327_vm2, %v1780_v17, 0.0 }
 0x68a   :  { %889 = vadd.xlane.f32.xlu0 %v888_v25  ;;  %v1058_v54 = vpop.permute.xlu1 %1057 }
 0x68c   :  { %v1782_v37 = vpop.eup %1781 }
 0x68d   :  { %v891_v31 = vsel %vm327_vm2, %v1782_v37, 0.0 }
 0x68e   :  { %892 = vadd.xlane.f32.xlu0 %v891_v31  ;;  %v1755_v31 = vld [vmem:[#allocation11 + $0x8] sm:$0xff]  }
 0x6a4   :  { %900 = vrot.lane.b32.xlu0 %v2120_v39, %s1956_s1 }
 0x6a8   :  { %1007 = vrot.lane.b32.xlu0 %v2103_v28, %s1957_s2 }
 0x713   :  { %v890_v38 = vpop.xlane.xlu0 %889 }
 0x714   :  { %1783 = vrcp.f32 %v890_v38  ;;  %v1756_v38 = vld [vmem:[#allocation11] sm:$0xff]  }
 0x717   :  { %v893_v41 = vpop.xlane.xlu0 %892 }
 0x718   :  { %1785 = vrcp.f32 %v893_v41 }
 0x71b   :  { %v901_v42 = vpop.permute.xlu0 %900 }
 0x71c   :  { %v906_v43 = vsel %vm447_vm3, %v901_v42, 0 }
 0x71d   :  { %1668 = vmatpush3.bf16.msra.mxu1 %v906_v43 }
 0x71e   :  { %1679 = vmatprep.subr.bf16.mxu1 %v1953_v0 }
 0x71f   :  { %v1008_v53 = vpop.permute.xlu0 %1007 }
 0x721   :  { %v1784_v44 = vpop.eup %1783 }
 0x722   :  { %v896_v46 = vmul.f32 %v1784_v44, %v1780_v17 }
 0x724   :  { %v898_v47 = vpack.c.bf16 %v896_v46, %v896_v46 }
 0x725   :  { %v1786_v48 = vpop.eup %1785 }
 0x726   :  { %1670 = vmatmul.mubr.msk.bf16.vlgmr.msra.gmra.mxu1 %vm327_vm2, %v898_v47  ;;  %v897_v28 = vmul.f32 %v1786_v48, %v1782_v37 }
 0x727   :  { %1680 = vmatpush3.bf16.xpose.msra.mxu1 %v1015_v49  ;;  %1681 = vmatprep.mubr.msk.bf16.mxu1 %vm1954_vm0, %v1953_v0 }
 0x728   :  { %v899_v51 = vpack.c.bf16 %v897_v28, %v897_v28  ;;  %1691 = vmatprep.subr.bf16.mxu1 %v1953_v0 }
 0x72a   :  { %1676 = vmatmul.mubr.msk.bf16.vlgmr.msra.gmra.mxu0 %vm327_vm2, %v899_v51 }
 0x72b   :  { %1686 = vmatpush3.bf16.xpose.msra.mxu0 %v1065_v52  ;;  %1687 = vmatprep.mubr.msk.bf16.mxu0 %vm1954_vm0, %v1953_v0 }
 0x72c   :  { %1697 = vmatprep.subr.bf16.mxu0 %v1953_v0 }
 0x72e   :  { %1682 = vmatmul.mubr.msk.bf16.vlgmr.msra.gmra.mxu1 %vm327_vm2, %v1008_v53  ;;  %v1757_v53 = vld [vmem:[%s2309_s9 + $0x8] sm:$0xff]  }
 0x72f   :  { %1693 = vmatprep.mubr.msk.bf16.mxu1 %vm1954_vm0, %v1953_v0 }
 0x732   :  { %1688 = vmatmul.mubr.msk.bf16.vlgmr.msra.gmra.mxu0 %vm327_vm2, %v1058_v54  ;;  %v1758_v54 = vld [vmem:[%s2309_s9] sm:$0xff]  }
 0x733   :  { %1699 = vmatprep.mubr.msk.bf16.mxu0 %vm1954_vm0, %v1953_v0 }
 0x7e6   :  { %v942_v55 = vpop.f32.mrf.mxu1 }
 0x7e8   :  { %v1671_v56 = vpop.f32.mrf.mxu1 }
 0x7e9   :  { %v1517_v56 = vld [vmem:[#allocation12] ss:$0 sm:$0xff] }
 0x7ea   :  { %v945_v57 = vpop.f32.mrf.mxu1  ;;  %v990_v58 = vpop.f32.mrf.mxu0 }
 0x7ec   :  { %v1672_v59 = vpop.f32.mrf.mxu1  ;;  %v1677_v60 = vpop.f32.mrf.mxu0 }
 0x7ee   :  { %v993_v61 = vpop.f32.mrf.mxu0  ;;  %v1051_v62 = vpop.f32.mrf.mxu1 }
 0x7ef   :  { %v1107_v63 = vsel %vm327_vm2, %v1051_v62, -inf }
 0x7f0   :  { %1108 = vmax.xlane.f32.xlu0 %v1107_v63  ;;  %v1678_v1 = vpop.f32.mrf.mxu0  ;;  %v1683_v2 = vpop.f32.mrf.mxu1 }
 0x7f2   :  { %v1054_v3 = vpop.f32.mrf.mxu1  ;;  %v1101_v4 = vpop.f32.mrf.mxu0 }
 0x7f3   :  { %v1110_v8 = vsel %vm327_vm2, %v1101_v4, -inf  ;;  %v1760_v3 = vld [vmem:[%s2311_s11 + $0x10] sm:$0xff]  }
 0x7f4   :  { %v1684_v9 = vpop.f32.mrf.mxu1  ;;  %1111 = vmax.xlane.f32.xlu1 %v1110_v8  ;;  %v1689_v11 = vpop.f32.mrf.mxu0 }
 0x7f6   :  { %v1104_v12 = vpop.f32.mrf.mxu0 }
 0x7f8   :  { %v1690_v13 = vpop.f32.mrf.mxu0 }
 0x805   :  { %1179 = vrot.lane.b32.xlu1 %v2122_v40, %s1957_s2 }
 0x809   :  { %767 = vrot.lane.b32.xlu1 %v2194_v7, %s1958_s14 }
 0x80d   :  { %769 = vrot.lane.b32.xlu1 %v2196_v10, %s1958_s14 }
 0x811   :  { %1000 = vrot.lane.b32.xlu1 %v990_v58, %s1959_s15 }
 0x879   :  { %v1109_v14 = vpop.xlane.xlu0 %1108 }
 0x87a   :  { %v1113_v15 = vsub.f32 %v1051_v62, %v1109_v14 }
 0x87c   :  { %v1115_v16 = vmul.f32 1.442695, %v1113_v15 }
 0x87d   :  { %v1112_v18 = vpop.xlane.xlu1 %1111 }
 0x87e   :  { %1787 = vpow2.f32 %v1115_v16  ;;  %v1114_v19 = vsub.f32 %v1101_v4, %v1112_v18  ;;  %v1761_v4 = vld [vmem:[%s2311_s11 + $0x8] sm:$0xff]  }
 0x880   :  { %v1117_v20 = vmul.f32 1.442695, %v1114_v19 }
 0x881   :  { %v1180_v21 = vpop.permute.xlu1 %1179 }
 0x882   :  { %1789 = vpow2.f32 %v1117_v20  ;;  %v1185_v40 = vsel %vm447_vm3, %v1180_v21, 0 }
 0x883   :  { %1698 = vmatpush3.bf16.msra.mxu0 %v1185_v40 }
 0x884   :  { %1711 = vmatprep.subr.bf16.mxu0 %v1953_v0 }
 0x885   :  { %v768_v7 = vpop.permute.xlu1 %767 }
 0x886   :  { %774 = vst.msk [vmem:[#allocation2] sm:$0xff] %vm773_vm4, %v768_v7 }
 0x889   :  { %v770_v10 = vpop.permute.xlu1 %769 }
 0x88a   :  { %775 = vst.msk [vmem:[#allocation2 + $0x8] sm:$0xff] %vm773_vm4, %v770_v10 }
 0x88b   :  { %v1788_v22 = vpop.eup %1787 }
 0x88c   :  { %v1119_v23 = vsel %vm327_vm2, %v1788_v22, 0.0 }
 0x88d   :  { %1120 = vadd.xlane.f32.xlu0 %v1119_v23  ;;  %v1001_v24 = vpop.permute.xlu1 %1000 }
 0x88e   :  { %1006 = vst.msk [vmem:[#allocation2 + $0x8] sm:$0xff] %vm1004_vm5, %v1001_v24 }
 0x88f   :  { %v1790_v26 = vpop.eup %1789 }
 0x890   :  { %v1122_v27 = vsel %vm327_vm2, %v1790_v26, 0.0 }
 0x891   :  { %1123 = vadd.xlane.f32.xlu0 %v1122_v27 }
 0x8a7   :  { %1131 = vrot.lane.b32.xlu0 %v2120_v39, %s1957_s2 }
 0x8ab   :  { %998 = vrot.lane.b32.xlu0 %v942_v55, %s1959_s15  ;;  %v1759_v55 = vld [vmem:[%s2311_s11 + $0x18] sm:$0xff]  }
 0x916   :  { %v1121_v29 = vpop.xlane.xlu0 %1120 }
 0x917   :  { %1791 = vrcp.f32 %v1121_v29 }
 0x91a   :  { %v1124_v30 = vpop.xlane.xlu0 %1123 }
 0x91b   :  { %1793 = vrcp.f32 %v1124_v30 }
 0x91e   :  { %v1132_v32 = vpop.permute.xlu0 %1131 }
 0x91f   :  { %v1137_v33 = vsel %vm447_vm3, %v1132_v32, 0 }
 0x920   :  { %1692 = vmatpush3.bf16.msra.mxu1 %v1137_v33 }
 0x921   :  { %1703 = vmatprep.subr.bf16.mxu1 %v1953_v0 }
 0x922   :  { %v999_v34 = vpop.permute.xlu0 %998 }
 0x923   :  { %1005 = vst.msk [vmem:[#allocation2] sm:$0xff] %vm1004_vm5, %v999_v34 }
 0x924   :  { %v1792_v35 = vpop.eup %1791 }
 0x925   :  { %v1127_v36 = vmul.f32 %v1792_v35, %v1788_v22 }
 0x927   :  { %v1129_v17 = vpack.c.bf16 %v1127_v36, %v1127_v36 }
 0x928   :  { %v1794_v25 = vpop.eup %1793 }
 0x929   :  { %1694 = vmatmul.mubr.msk.bf16.vlgmr.msra.gmra.mxu1 %vm327_vm2, %v1129_v17  ;;  %v1128_v39 = vmul.f32 %v1794_v25, %v1790_v26 }
 0x92a   :  { %1707 = vmatprep.mubr.msk.bf16.mxu1 %vm1954_vm0, %v1953_v0  ;;  %1704 = vmatpush3.bf16.msra.mxu1 %v1755_v31 }
 0x92b   :  { %v1130_v37 = vpack.c.bf16 %v1128_v39, %v1128_v39  ;;  %1705 = vmatprep.subr.bf16.mxu1 %v1953_v0 }
 0x92d   :  { %1700 = vmatmul.mubr.msk.bf16.vlgmr.msra.gmra.mxu0 %vm327_vm2, %v1130_v37 }
 0x92e   :  { %1715 = vmatprep.mubr.msk.bf16.mxu0 %vm1954_vm0, %v1953_v0  ;;  %1706 = vmatpush3.bf16.msra.mxu1 %v1756_v38 }
 0x92f   :  { %1719 = vmatprep.subr.bf16.mxu1 %v1953_v0  ;;  %1712 = vmatpush3.bf16.msra.mxu0 %v1757_v53 }
 0x930   :  { %1713 = vmatprep.subr.bf16.mxu0 %v1953_v0 }
 0x933   :  { %1714 = vmatpush3.bf16.msra.mxu0 %v1758_v54 }
 0x9e9   :  { %v1173_v41 = vpop.f32.mrf.mxu1 }
 0x9ea   :  { %1229 = vrot.lane.b32.xlu0 %v1173_v41, %s1960_s16 }
 0x9eb   :  { %v1695_v42 = vpop.f32.mrf.mxu1 }
 0x9ed   :  { %v1176_v43 = vpop.f32.mrf.mxu1  ;;  %v1221_v44 = vpop.f32.mrf.mxu0 }
 0x9ee   :  { %1231 = vrot.lane.b32.xlu1 %v1221_v44, %s1960_s16 }
 0x9ef   :  { %v1696_v45 = vpop.f32.mrf.mxu1  ;;  %v1701_v46 = vpop.f32.mrf.mxu0 }
 0x9f1   :  { %v1224_v47 = vpop.f32.mrf.mxu0 }
 0x9f3   :  { %v1702_v48 = vpop.f32.mrf.mxu0 }
 0xa5c   :  { %v1230_v49 = vpop.permute.xlu0 %1229 }
 0xa5d   :  { %1236 = vst.msk [vmem:[#allocation2] sm:$0xff] %vm1235_vm6, %v1230_v49 }
 0xa60   :  { %v1232_v28 = vpop.permute.xlu1 %1231 }
 0xa61   :  { %1237 = vst.msk [vmem:[#allocation2 + $0x8] sm:$0xff] %vm1235_vm6, %v1232_v28 }
 0xa64   :  { %v1238_v50 = vld [vmem:[#allocation2] sm:$0xff] }
 0xa68   :  { %v1239_v51 = vld [vmem:[#allocation2 + $0x8] sm:$0xff] }
 0xa69   :  { %v1240_v52 = vpack.c.bf16 %v1239_v51, %v1238_v50 }
 0xa6b   :  { %1708 = vmatmul.mubr.msk.bf16.vlgmr.msra.gmra.mxu1 %vm146_vm1, %v1240_v52 }
 0xa6c   :  { %1727 = vmatprep.mubr.msk.bf16.mxu1 %vm1954_vm0, %v1953_v0  ;;  %1720 = vmatpush3.bf16.msra.mxu1 %v1759_v55 }
 0xa6d   :  { %1721 = vmatprep.subr.bf16.mxu1 %v1953_v0 }
 0xa70   :  { %1722 = vmatpush3.bf16.msra.mxu1 %v1760_v3 }
 0xa71   :  { %1723 = vmatprep.subr.bf16.mxu1 %v1953_v0 }
 0xa74   :  { %1724 = vmatpush3.bf16.msra.mxu1 %v1761_v4 }
 0xa75   :  { %1725 = vmatprep.subr.bf16.mxu1 %v1953_v0  ;;  %v1525_v0 = vld [vmem:[%s2312_s12] ss:$0 sm:$0xff] }
 0xb2b   :  { %v1301_v57 = vpop.f32.mrf.mxu1 }
 0xb2c   :  { %v1302_v59 = vadd.f32 %v1517_v56, %v1301_v57 }
 0xb2d   :  { %v1709_v58 = vpop.f32.mrf.mxu1 }
 0xb2e   :  { %v1308_v63 = vadd.f32 %v1302_v59, %v2074_v5  ;;  %v1762_v5 = vld [vmem:[%s2311_s11] sm:$0xff]  }
 0xb2f   :  { %v1304_v60 = vpop.f32.mrf.mxu1  ;;  %1726 = vmatpush3.bf16.msra.mxu1 %v1762_v5 }
 0xb30   :  { %v1305_v61 = vadd.f32 %v1517_v56, %v1304_v60 }
 0xb31   :  { %v1710_v62 = vpop.f32.mrf.mxu1 }
 0xb32   :  { %v1309_v1 = vadd.f32 %v1305_v61, %v2079_v6  ;;  %v1521_v6 = vld [vmem:[%s2310_s10] ss:$0 sm:$0xff]  ;;  %s1961_s10 = smov [#allocation14]  }
 0xb33   :  { %s1474_s11 = sshll.u32 %s1961_s10, 4  ;;  %s1475_s11 = int_to_ptr.vmem [resolvable:$true] %s1474_s11 }
 0xb34   :  { %v1310_v2 = vpack.c.bf16 %v1309_v1, %v1308_v63  ;;  %s1915_s27 = scalar_lea.vmem %s1475_s11, 256  ;;  %p1920_p3 = scmp.lt.s32.totalorder %s1475_s11, %s1475_s11 }
 0xb35   :  { %p1916_p2 = scmp.ne.s32.totalorder %s1475_s11, %s1915_s27  ;;  %p1921_p4 = scmp.lt.s32.totalorder %s1915_s27, %s1915_s27 }
 0xb36   :  { %1716 = vmatmul.mubr.msk.bf16.vlgmr.msra.gmra.mxu0 %vm146_vm1, %v1310_v2 }
 0xb37   :  { %p1922_p5 = por %p1921_p4, %p1920_p3 }
 0xb39   :  { %p1923_p6 = pnand %p1922_p5, %p1916_p2 }
 0xbf6   :  { %v1371_v8 = vpop.f32.mrf.mxu0 }
 0xbf7   :  { %v1372_v11 = vadd.f32 %v1521_v6, %v1371_v8 }
 0xbf8   :  { %v1717_v9 = vpop.f32.mrf.mxu0 }
 0xbf9   :  { %v1378_v15 = vmax.f32 %v1372_v11, 0.0 }
 0xbfa   :  { %v1374_v12 = vpop.f32.mrf.mxu0 }
 0xbfb   :  { %v1375_v13 = vadd.f32 %v1521_v6, %v1374_v12 }
 0xbfc   :  { %v1718_v14 = vpop.f32.mrf.mxu0 }
 0xbfd   :  { %v1379_v16 = vmax.f32 %v1375_v13, 0.0 }
 0xbff   :  { %v1380_v18 = vpack.c.bf16 %v1379_v16, %v1378_v15 }
 0xc01   :  { %1728 = vmatmul.mubr.msk.bf16.vlgmr.msra.gmra.mxu1 %vm1420_vm7, %v1380_v18 }
 0xcc1   :  { %v1458_v19 = vpop.f32.mrf.mxu1 }
 0xcc2   :  { %v1459_v20 = vadd.f32 %v1525_v0, %v1458_v19 }
 0xcc3   :  { %v1729_v21 = vpop.f32.mrf.mxu1 }
 0xcc4   :  { %v1465_v40 = vadd.f32 %v1459_v20, %v1308_v63 }
 0xcc5   :  { %v1461_v7 = vpop.f32.mrf.mxu1 }
 0xcc6   :  { %1467 = vst.msk [vmem:[#allocation14] sm:$0xff] %vm146_vm1, %v1465_v40  ;;  %v1462_v10 = vadd.f32 %v1525_v0, %v1461_v7 }
 0xcc7   :  { %v1730_v22 = vpop.f32.mrf.mxu1 }
 0xcc8   :  { %v1466_v23 = vadd.f32 %v1462_v10, %v1309_v1 }
 0xcca   :  { %1468 = vst.msk [vmem:[#allocation14 + $0x8] sm:$0xff] %vm146_vm1, %v1466_v23 }
 0xccb   :  { %1926 = shalt.err (!%p1923_p6)
}
 0xccc   :  { %s1962_s12 = smov 128  }
 0xccd   :  { %1480 = dma.vmem_to_hbm [thread:$0]  %s1475_s11, 256, %s2313_s13, [#allocation5], %s1962_s12, %s1962_s12, %s1958_s14  }
 0xcce   :  { %1943 = dma.done.wait [#allocation5], 256  }
 0xccf   :  { %1944 = vsyncadd [#allocation5], 4294967040 }
 0xcd0   :  { %1484 = vsyncpa [#allocation4], 1 }
 0xcd1   :  { %1485 = vsyncpa [#allocation7], 1 }
 0xcd2   :  { %1486 = vsyncpa [#allocation10], 1 }
 0xcd3   :  { %1487 = vsyncpa [#allocation13], 1 }
 0xcd4   :  { %1488 = vsyncpa [#allocation5], 1 }

</bundles_post_ra>
